<compile_context>
chip_gen: v7x
topology: tpu7x:2x2x1
jax: 0.10.0
libtpu: 0.0.40
codegen_flags: <defaults>
</compile_context>

<pallas_src>
import functools
import math

import jax
import jax.numpy as jnp
from jax import lax
from jax.experimental import pallas as pl
from jax.experimental.pallas import tpu as pltpu

LN_EPS = 1e-12                   # matches BertLayerNorm(eps=1e-12)
INV_SQRT2 = 0.7071067811865476   # 1/sqrt(2) for the exact (erf) GeLU
RESIDENT_A_LIMIT = 2048          # keep W2 fully resident when padded A <= this
ANSWER_TILE = 512                # W2 / output block width when streaming the answer dim


def _round_up(x, m):
    return ((x + m - 1) // m) * m


def _maybe_single_buffered(block_shape, index_map, single_buffer):
    """BlockSpec for an operand fetched once (constant index): single VMEM buffer."""
    if single_buffer:
        try:
            return pl.BlockSpec(block_shape, index_map, pipeline_mode=pl.Buffered(1))
        except TypeError:  # older jax without pipeline_mode -> default double buffer
            pass
    return pl.BlockSpec(block_shape, index_map)


def _default_row_tile():
    """512-row tiles on 128-MiB-VMEM chips (v5e/v6e), 256 on v7x (64 MiB)."""
    try:
        vmem = pltpu.get_tpu_info().vmem_capacity_bytes
    except Exception:
        return 256
    return 512 if vmem >= (100 << 20) else 256


def visual_answer_head_kernel(x_ref, w1_ref, p_ref, w2_ref, b2_ref, o_ref, ln_ref,
                              *, exact_gelu=True):
    # x_ref:  (tm, H)    streamed activation tile (only consumed at j == 0)
    # w1_ref: (H, 2H)    resident W1^T, bf16
    # p_ref:  (3, 2H)    packed [b1; gamma; beta], f32
    # w2_ref: (2H, tn)   W2^T block, bf16 (fully resident when grid_n == 1)
    # b2_ref: (1, tn)    bias-2 block, f32
    # o_ref:  (tm, tn)   lane-dense output block
    # ln_ref: (tm, 2H)   bf16 VMEM scratch holding the LayerNorm output,
    #                    persistent across the answer-block ("arbitrary") axis.
    j = pl.program_id(1)

    @pl.when(j == 0)
    def _():
        # GEMM 1: bf16 operands -> f32 MXU accumulation.
        x = x_ref[...].astype(jnp.bfloat16)
        h = jnp.dot(x, w1_ref[...], preferred_element_type=jnp.float32)
        h = h + p_ref[0:1, :]
        if exact_gelu:
            # Exact GeLU: x * 0.5 * (1 + erf(x / sqrt(2)))  -- matches the module.
            h = h * 0.5 * (1.0 + lax.erf(h * INV_SQRT2))
        else:
            # tanh approximation rides the EUP slot (cheaper, different numerics).
            h = jax.nn.gelu(h, approximate=True)
        # One-pass LayerNorm statistics: the two row reductions are independent.
        mean = jnp.mean(h, axis=-1, keepdims=True)
        mean_sq = jnp.mean(h * h, axis=-1, keepdims=True)
        var = jnp.maximum(mean_sq - mean * mean, 0.0)     # clamp: guard rsqrt
        ln = (h - mean) * lax.rsqrt(var + LN_EPS)
        ln = ln * p_ref[1:2, :] + p_ref[2:3, :]
        ln_ref[...] = ln.astype(jnp.bfloat16)

    # GEMM 2: bf16 operands -> f32 accumulation, bias, cast to output dtype.
    out = jnp.dot(ln_ref[...], w2_ref[...], preferred_element_type=jnp.float32)
    o_ref[...] = (out + b2_ref[...]).astype(o_ref.dtype)


def prepare_params(w1, b1, gamma, beta, w2, b2):
    """One-time parameter preprocessing (run at load time, NOT per forward call):
    transpose + bf16-cast weights, pack b1/gamma/beta into one operand, and pad the
    answer dim to a lane-dense multiple of 128 (or of ANSWER_TILE when streamed)."""
    H2, H = w1.shape
    A = w2.shape[0]
    a_pad = _round_up(A, 128)
    if a_pad > RESIDENT_A_LIMIT:
        a_pad = _round_up(A, ANSWER_TILE)

    w1_t = jnp.asarray(w1, jnp.float32).T.astype(jnp.bfloat16)              # (H, 2H)
    packed = jnp.stack([jnp.asarray(b1, jnp.float32),
                        jnp.asarray(gamma, jnp.float32),
                        jnp.asarray(beta, jnp.float32)])                    # (3, 2H)
    w2_t = jnp.zeros((H2, a_pad), jnp.bfloat16)
    w2_t = w2_t.at[:, :A].set(jnp.asarray(w2, jnp.float32).T.astype(jnp.bfloat16))
    b2_p = jnp.zeros((1, a_pad), jnp.float32).at[0, :A].set(jnp.asarray(b2, jnp.float32))
    return dict(w1_t=w1_t, packed=packed, w2_t=w2_t, b2=b2_p, num_answers=A)


@functools.partial(
    jax.jit,
    static_argnames=("num_answers", "tm", "out_dtype", "exact_gelu",
                     "vmem_limit_bytes", "single_buffer_residents"))
def bert_visual_answer_head(hidden_states, w1_t, packed, w2_t, b2, *, num_answers,
                            tm=None, out_dtype=None, exact_gelu=True,
                            vmem_limit_bytes=None, single_buffer_residents=True):
    """
    hidden_states: (..., H)
    w1_t:   (H, 2H)  bf16        packed: (3, 2H) f32 = [b1; gamma; beta]
    w2_t:   (2H, A_pad) bf16     b2: (1, A_pad) f32        (from prepare_params)
    Returns (..., num_answers). out_dtype=jnp.bfloat16 halves the HBM writeback
    if downstream tolerates it (default mirrors hidden_states.dtype).
    """
    *lead, H = hidden_states.shape
    M = 1
    for d in lead:
        M *= d
    H2 = w1_t.shape[1]
    a_pad = w2_t.shape[1]
    out_dtype = jnp.dtype(hidden_states.dtype) if out_dtype is None else jnp.dtype(out_dtype)

    x2d = hidden_states.reshape(M, H)

    # --- Row tiling: large tile, but keep >= 2 row blocks for v7x megacore. ---
    if tm is None:
        tm = _default_row_tile()
    tm_eff = M if M < 16 else min(tm, _round_up(M, 16))
    grid_m = pl.cdiv(M, tm_eff)
    if grid_m == 1 and M > 128:
        tm_eff = _round_up(pl.cdiv(M, 2), 16)    # split rows across the 2 v7x cores
        grid_m = pl.cdiv(M, tm_eff)

    # --- Answer tiling: fully resident W2 for small vocab, streamed otherwise. ---
    tn = a_pad if a_pad <= RESIDENT_A_LIMIT else ANSWER_TILE
    grid_n = a_pad // tn
    w2_resident = grid_n == 1

    # --- Explicit scoped-VMEM limit from the real footprint (v5e default = 16 MiB). ---
    in_bytes = jnp.dtype(hidden_states.dtype).itemsize
    est = (2 * tm_eff * H * in_bytes                       # x tile, double-buffered
           + H * H2 * 2                                    # resident W1^T (bf16, 1 buffer)
           + 8 * H2 * 4                                    # packed b1/gamma/beta tile
           + (1 if w2_resident else 2) * (H2 * tn * 2 + 8 * tn * 4)   # W2 + b2 block(s)
           + 2 * tm_eff * tn * out_dtype.itemsize          # output tile, double-buffered
           + tm_eff * H2 * 2)                              # bf16 LayerNorm scratch
    if vmem_limit_bytes is None:
        vmem_limit_bytes = int(min(max(int(est * 1.5) + (2 << 20), 32 << 20), 100 << 20))

    def res_spec(shape, imap):
        return _maybe_single_buffered(shape, imap, single_buffer_residents)

    def w2_spec(shape, imap):
        return res_spec(shape, imap) if w2_resident else pl.BlockSpec(shape, imap)

    out2d = pl.pallas_call(
        functools.partial(visual_answer_head_kernel, exact_gelu=exact_gelu),
        out_shape=jax.ShapeDtypeStruct((M, a_pad), out_dtype),
        grid_spec=pltpu.PrefetchScalarGridSpec(
            num_scalar_prefetch=0,
            grid=(grid_m, grid_n),
            in_specs=[
                pl.BlockSpec((tm_eff, H), lambda i, j: (i, 0)),   # streamed x tile
                res_spec((H, H2), lambda i, j: (0, 0)),           # resident W1^T (bf16)
                res_spec((3, H2), lambda i, j: (0, 0)),           # packed b1/gamma/beta
                w2_spec((H2, tn), lambda i, j: (0, j)),           # W2^T block (bf16)
                w2_spec((1, tn), lambda i, j: (0, j)),            # b2 block
            ],
            out_specs=pl.BlockSpec((tm_eff, tn), lambda i, j: (i, j)),  # lane-dense
            scratch_shapes=[pltpu.VMEM((tm_eff, H2), jnp.bfloat16)],    # LN intermediate
        ),
        compiler_params=pltpu.CompilerParams(
            dimension_semantics=("parallel", "arbitrary"),
            vmem_limit_bytes=vmem_limit_bytes,
        ),
    )(x2d, w1_t, packed, w2_t, b2)

    out = out2d[:, :num_answers]
    return out.reshape(*lead, num_answers)


def bert_visual_answer_head_ref(hidden_states, w1, b1, gamma, beta, w2, b2, *,
                                mixed_precision=True):
    """Pure-JAX reference. mixed_precision=True mirrors the kernel recipe (bf16 GEMM
    operands, one-pass f32 LN stats); False is the exact f32 PyTorch semantics."""
    def mm(a, b):
        if mixed_precision:
            a = a.astype(jnp.bfloat16)
            b = b.astype(jnp.bfloat16)
        return jnp.dot(a, b, preferred_element_type=jnp.float32)

    x = hidden_states.astype(jnp.float32)
    h = mm(x, w1.T) + b1
    h = h * 0.5 * (1.0 + lax.erf(h * INV_SQRT2))
    mean = jnp.mean(h, axis=-1, keepdims=True)
    if mixed_precision:
        var = jnp.maximum(jnp.mean(h * h, axis=-1, keepdims=True) - mean * mean, 0.0)
    else:
        var = jnp.mean((h - mean) ** 2, axis=-1, keepdims=True)
    ln = (h - mean) * lax.rsqrt(var + LN_EPS) * gamma + beta
    return mm(ln, w2.T) + b2


if __name__ == "__main__":
    # Small shapes consistent with the module: hid_dim=128 -> intermediate 2H=256,
    # num_answers=128 (lane-dense), batch=2, seq=8.
    B, S, H, A = 2, 8, 128, 128
    H2 = 2 * H

    key = jax.random.PRNGKey(0)
    k1, k2, k3, k4, k5, k6, k7 = jax.random.split(key, 7)

    hidden_states = jax.random.normal(k1, (B, S, H), dtype=jnp.float32)
    # nn.Linear(H, 2H): weight (2H, H), bias (2H,)
    w1 = jax.random.normal(k2, (H2, H), dtype=jnp.float32) * (1.0 / math.sqrt(H))
    b1 = 0.01 * jax.random.normal(k3, (H2,), dtype=jnp.float32)
    # LayerNorm(2H) affine params (torch default gamma=1, beta=0; perturb slightly)
    gamma = 1.0 + 0.01 * jax.random.normal(k4, (H2,), dtype=jnp.float32)
    beta = 0.01 * jax.random.normal(k5, (H2,), dtype=jnp.float32)
    # nn.Linear(2H, num_answers): weight (A, 2H), bias (A,)
    w2 = jax.random.normal(k6, (A, H2), dtype=jnp.float32) * (1.0 / math.sqrt(H2))
    b2 = 0.01 * jax.random.normal(k7, (A,), dtype=jnp.float32)

    # One-time weight preprocessing (hoisted out of the per-call path).
    params = prepare_params(w1, b1, gamma, beta, w2, b2)

    try:
        out = bert_visual_answer_head(hidden_states, **params)
        out = jax.block_until_ready(out)
    except Exception:
        # Fallback for jax builds where pl.Buffered(1) is not lowerable on TPU.
        out = bert_visual_answer_head(hidden_states, single_buffer_residents=False, **params)
        out = jax.block_until_ready(out)
    assert out.shape == (B, S, A)

    # Tight check vs a reference using the same mixed-precision recipe.
    ref_mp = bert_visual_answer_head_ref(hidden_states, w1, b1, gamma, beta, w2, b2,
                                         mixed_precision=True)
    assert jnp.allclose(out, ref_mp, atol=2e-3, rtol=2e-3), "mismatch vs mixed-precision reference"
    # Loose sanity check vs the exact all-f32 module semantics (bf16 GEMMs are the
    # only deliberate approximation).
    ref_f32 = bert_visual_answer_head_ref(hidden_states, w1, b1, gamma, beta, w2, b2,
                                          mixed_precision=False)
    assert jnp.allclose(out, ref_f32, atol=7e-2, rtol=7e-2), "mismatch vs f32 reference"

    print("KERNEL_OK")
</pallas_src>

<mosaic_0001>
module attributes {stable_mosaic.version = 11 : i64} {
  func.func @visual_answer_head_kernel(%arg0: i32, %arg1: i32, %arg2: memref<16x128xf32, #tpu.memory_space<vmem>>, %arg3: memref<128x256xbf16, #tpu.memory_space<vmem>>, %arg4: memref<3x256xf32, #tpu.memory_space<vmem>>, %arg5: memref<256x128xbf16, #tpu.memory_space<vmem>>, %arg6: memref<1x128xf32, #tpu.memory_space<vmem>>, %arg7: memref<16x128xf32, #tpu.memory_space<vmem>>, %arg8: memref<16x256xbf16, #tpu.memory_space<vmem>>) attributes {dimension_semantics = [#tpu.dimension_semantics<parallel>, #tpu.dimension_semantics<arbitrary>], iteration_bounds = array<i64: 1, 1>, scalar_prefetch = 0 : i64, scratch_operands = 1 : i64, tpu.core_type = #tpu.core_type<tc>, window_params = [{transform_indices = @transform_0, window_bounds = array<i64: 16, 128>}, {pipeline_mode = #tpu.pipeline_mode<synchronous>, transform_indices = @transform_1, window_bounds = array<i64: 128, 256>}, {pipeline_mode = #tpu.pipeline_mode<synchronous>, transform_indices = @transform_2, window_bounds = array<i64: 3, 256>}, {pipeline_mode = #tpu.pipeline_mode<synchronous>, transform_indices = @transform_3, window_bounds = array<i64: 256, 128>}, {pipeline_mode = #tpu.pipeline_mode<synchronous>, transform_indices = @transform_4, window_bounds = array<i64: 1, 128>}, {transform_indices = @transform_5, window_bounds = array<i64: 16, 128>}]} {
    %c0_i32 = arith.constant 0 : i32
    %0 = arith.cmpi eq, %arg1, %c0_i32 : i32
    %1 = arith.extui %0 : i1 to i32
    %c0_i32_0 = arith.constant 0 : i32
    %2 = arith.cmpi ne, %1, %c0_i32_0 : i32
    scf.if %2 {
      %c0_8 = arith.constant 0 : index
      %c0_9 = arith.constant 0 : index
      %10 = vector.load %arg2[%c0_8, %c0_9] : memref<16x128xf32, #tpu.memory_space<vmem>>, vector<16x128xf32>
      %11 = arith.truncf %10 : vector<16x128xf32> to vector<16x128xbf16>
      %c0_10 = arith.constant 0 : index
      %c0_11 = arith.constant 0 : index
      %12 = vector.load %arg3[%c0_10, %c0_11] : memref<128x256xbf16, #tpu.memory_space<vmem>>, vector<128x256xbf16>
      %cst_12 = arith.constant dense<0.000000e+00> : vector<16x256xf32>
      %13 = tpu.matmul %11, %12, %cst_12 {dimension_numbers = #tpu.dot_dimension_numbers<[1], [0], [0], [1], [0, 0, 1, 1], [], []>} : vector<16x128xbf16>, vector<128x256xbf16>, vector<16x256xf32> -> vector<16x256xf32>
      %c0_13 = arith.constant 0 : index
      %c0_14 = arith.constant 0 : index
      %14 = vector.load %arg4[%c0_13, %c0_14] : memref<3x256xf32, #tpu.memory_space<vmem>>, vector<1x256xf32>
      %15 = vector.broadcast %14 : vector<1x256xf32> to vector<16x256xf32>
      %16 = arith.addf %13, %15 : vector<16x256xf32>
      %cst_15 = arith.constant 5.000000e-01 : f32
      %17 = vector.broadcast %cst_15 : f32 to vector<16x256xf32>
      %18 = arith.mulf %16, %17 : vector<16x256xf32>
      %cst_16 = arith.constant 0.707106769 : f32
      %19 = vector.broadcast %cst_16 : f32 to vector<16x256xf32>
      %20 = arith.mulf %16, %19 : vector<16x256xf32>
      %21 = math.erf %20 : vector<16x256xf32>
      %cst_17 = arith.constant 1.000000e+00 : f32
      %22 = vector.broadcast %cst_17 : f32 to vector<16x256xf32>
      %23 = arith.addf %22, %21 : vector<16x256xf32>
      %24 = arith.mulf %18, %23 : vector<16x256xf32>
      %cst_18 = arith.constant dense<0.000000e+00> : vector<16xf32>
      %25 = vector.multi_reduction <add>, %24, %cst_18 [1] : vector<16x256xf32> to vector<16xf32>
      %26 = vector.shape_cast %25 : vector<16xf32> to vector<16x1xf32>
      %cst_19 = arith.constant 2.560000e+02 : f32
      %27 = vector.broadcast %cst_19 : f32 to vector<16x1xf32>
      %28 = arith.divf %26, %27 : vector<16x1xf32>
      %29 = arith.mulf %24, %24 : vector<16x256xf32>
      %cst_20 = arith.constant dense<0.000000e+00> : vector<16xf32>
      %30 = vector.multi_reduction <add>, %29, %cst_20 [1] : vector<16x256xf32> to vector<16xf32>
      %31 = vector.shape_cast %30 : vector<16xf32> to vector<16x1xf32>
      %cst_21 = arith.constant 2.560000e+02 : f32
      %32 = vector.broadcast %cst_21 : f32 to vector<16x1xf32>
      %33 = arith.divf %31, %32 : vector<16x1xf32>
      %34 = arith.mulf %28, %28 : vector<16x1xf32>
      %35 = arith.subf %33, %34 : vector<16x1xf32>
      %cst_22 = arith.constant 0.000000e+00 : f32
      %36 = vector.broadcast %cst_22 : f32 to vector<16x1xf32>
      %37 = arith.maximumf %35, %36 : vector<16x1xf32>
      %38 = vector.broadcast %28 : vector<16x1xf32> to vector<16x256xf32>
      %39 = arith.subf %24, %38 : vector<16x256xf32>
      %cst_23 = arith.constant 9.99999996E-13 : f32
      %40 = vector.broadcast %cst_23 : f32 to vector<16x1xf32>
      %41 = arith.addf %37, %40 : vector<16x1xf32>
      %42 = math.rsqrt %41 : vector<16x1xf32>
      %43 = vector.broadcast %42 : vector<16x1xf32> to vector<16x256xf32>
      %44 = arith.mulf %39, %43 : vector<16x256xf32>
      %c1 = arith.constant 1 : index
      %c0_24 = arith.constant 0 : index
      %45 = vector.load %arg4[%c1, %c0_24] : memref<3x256xf32, #tpu.memory_space<vmem>>, vector<1x256xf32>
      %46 = vector.broadcast %45 : vector<1x256xf32> to vector<16x256xf32>
      %47 = arith.mulf %44, %46 : vector<16x256xf32>
      %c2 = arith.constant 2 : index
      %c0_25 = arith.constant 0 : index
      %48 = vector.load %arg4[%c2, %c0_25] : memref<3x256xf32, #tpu.memory_space<vmem>>, vector<1x256xf32>
      %49 = vector.broadcast %48 : vector<1x256xf32> to vector<16x256xf32>
      %50 = arith.addf %47, %49 : vector<16x256xf32>
      %51 = arith.truncf %50 : vector<16x256xf32> to vector<16x256xbf16>
      %c0_26 = arith.constant 0 : index
      %c0_27 = arith.constant 0 : index
      %52 = vector.load %arg8[%c0_26, %c0_27] : memref<16x256xbf16, #tpu.memory_space<vmem>>, vector<16x256xbf16>
      tpu.vector_store %arg8[%c0_26, %c0_27], %51 {strides = array<i32>} : memref<16x256xbf16, #tpu.memory_space<vmem>>, vector<16x256xbf16>,
    } else {
    }
    %c0 = arith.constant 0 : index
    %c0_1 = arith.constant 0 : index
    %3 = vector.load %arg8[%c0, %c0_1] : memref<16x256xbf16, #tpu.memory_space<vmem>>, vector<16x256xbf16>
    %c0_2 = arith.constant 0 : index
    %c0_3 = arith.constant 0 : index
    %4 = vector.load %arg5[%c0_2, %c0_3] : memref<256x128xbf16, #tpu.memory_space<vmem>>, vector<256x128xbf16>
    %cst = arith.constant dense<0.000000e+00> : vector<16x128xf32>
    %5 = tpu.matmul %3, %4, %cst {dimension_numbers = #tpu.dot_dimension_numbers<[1], [0], [0], [1], [0, 0, 1, 1], [], []>} : vector<16x256xbf16>, vector<256x128xbf16>, vector<16x128xf32> -> vector<16x128xf32>
    %c0_4 = arith.constant 0 : index
    %c0_5 = arith.constant 0 : index
    %6 = vector.load %arg6[%c0_4, %c0_5] : memref<1x128xf32, #tpu.memory_space<vmem>>, vector<1x128xf32>
    %7 = vector.broadcast %6 : vector<1x128xf32> to vector<16x128xf32>
    %8 = arith.addf %5, %7 : vector<16x128xf32>
    %c0_6 = arith.constant 0 : index
    %c0_7 = arith.constant 0 : index
    %9 = vector.load %arg7[%c0_6, %c0_7] : memref<16x128xf32, #tpu.memory_space<vmem>>, vector<16x128xf32>
    tpu.vector_store %arg7[%c0_6, %c0_7], %8 {strides = array<i32>} : memref<16x128xf32, #tpu.memory_space<vmem>>, vector<16x128xf32>,
    return
  }
  func.func @transform_0(%arg0: i32, %arg1: i32) -> (i32, i32) {
    %c0_i32 = arith.constant 0 : i32
    %c0_i32_0 = arith.constant 0 : i32
    return %arg0, %c0_i32 : i32, i32
  }
  func.func @transform_1(%arg0: i32, %arg1: i32) -> (i32, i32) {
    %c0_i32 = arith.constant 0 : i32
    %c0_i32_0 = arith.constant 0 : i32
    %c0_i32_1 = arith.constant 0 : i32
    return %c0_i32, %c0_i32_0 : i32, i32
  }
  func.func @transform_2(%arg0: i32, %arg1: i32) -> (i32, i32) {
    %c0_i32 = arith.constant 0 : i32
    %c0_i32_0 = arith.constant 0 : i32
    %c0_i32_1 = arith.constant 0 : i32
    return %c0_i32, %c0_i32_0 : i32, i32
  }
  func.func @transform_3(%arg0: i32, %arg1: i32) -> (i32, i32) {
    %c0_i32 = arith.constant 0 : i32
    %c0_i32_0 = arith.constant 0 : i32
    return %c0_i32, %arg1 : i32, i32
  }
  func.func @transform_4(%arg0: i32, %arg1: i32) -> (i32, i32) {
    %c0_i32 = arith.constant 0 : i32
    %c0_i32_0 = arith.constant 0 : i32
    return %c0_i32, %arg1 : i32, i32
  }
  func.func @transform_5(%arg0: i32, %arg1: i32) -> (i32, i32) {
    %c0_i32 = arith.constant 0 : i32
    return %arg0, %arg1 : i32, i32
  }
}

module attributes {stable_mosaic.version = 11 : i64} {
  func.func @visual_answer_head_kernel(%arg0: i32, %arg1: i32, %arg2: memref<16x128xf32, #tpu.memory_space<vmem>>, %arg3: memref<128x256xbf16, #tpu.memory_space<vmem>>, %arg4: memref<3x256xf32, #tpu.memory_space<vmem>>, %arg5: memref<256x128xbf16, #tpu.memory_space<vmem>>, %arg6: memref<1x128xf32, #tpu.memory_space<vmem>>, %arg7: memref<16x128xf32, #tpu.memory_space<vmem>>, %arg8: memref<16x256xbf16, #tpu.memory_space<vmem>>) attributes {dimension_semantics = [#tpu.dimension_semantics<parallel>, #tpu.dimension_semantics<arbitrary>], iteration_bounds = array<i64: 1, 1>, scalar_prefetch = 0 : i64, scratch_operands = 1 : i64, tpu.core_type = #tpu.core_type<tc>, window_params = [{transform_indices = @transform_0, window_bounds = array<i64: 16, 128>}, {pipeline_mode = #tpu.pipeline_mode<synchronous>, transform_indices = @transform_1, window_bounds = array<i64: 128, 256>}, {pipeline_mode = #tpu.pipeline_mode<synchronous>, transform_indices = @transform_2, window_bounds = array<i64: 3, 256>}, {transform_indices = @transform_3, window_bounds = array<i64: 256, 128>}, {transform_indices = @transform_4, window_bounds = array<i64: 1, 128>}, {transform_indices = @transform_5, window_bounds = array<i64: 16, 128>}]} {
    %c0_i32 = arith.constant 0 : i32
    %0 = arith.cmpi eq, %arg1, %c0_i32 : i32
    %1 = arith.extui %0 : i1 to i32
    %c0_i32_0 = arith.constant 0 : i32
    %2 = arith.cmpi ne, %1, %c0_i32_0 : i32
    scf.if %2 {
      %c0_8 = arith.constant 0 : index
      %c0_9 = arith.constant 0 : index
      %10 = vector.load %arg2[%c0_8, %c0_9] : memref<16x128xf32, #tpu.memory_space<vmem>>, vector<16x128xf32>
      %11 = arith.truncf %10 : vector<16x128xf32> to vector<16x128xbf16>
      %c0_10 = arith.constant 0 : index
      %c0_11 = arith.constant 0 : index
      %12 = vector.load %arg3[%c0_10, %c0_11] : memref<128x256xbf16, #tpu.memory_space<vmem>>, vector<128x256xbf16>
      %cst_12 = arith.constant dense<0.000000e+00> : vector<16x256xf32>
      %13 = tpu.matmul %11, %12, %cst_12 {dimension_numbers = #tpu.dot_dimension_numbers<[1], [0], [0], [1], [0, 0, 1, 1], [], []>} : vector<16x128xbf16>, vector<128x256xbf16>, vector<16x256xf32> -> vector<16x256xf32>
      %c0_13 = arith.constant 0 : index
      %c0_14 = arith.constant 0 : index
      %14 = vector.load %arg4[%c0_13, %c0_14] : memref<3x256xf32, #tpu.memory_space<vmem>>, vector<1x256xf32>
      %15 = vector.broadcast %14 : vector<1x256xf32> to vector<16x256xf32>
      %16 = arith.addf %13, %15 : vector<16x256xf32>
      %cst_15 = arith.constant 5.000000e-01 : f32
      %17 = vector.broadcast %cst_15 : f32 to vector<16x256xf32>
      %18 = arith.mulf %16, %17 : vector<16x256xf32>
      %cst_16 = arith.constant 0.707106769 : f32
      %19 = vector.broadcast %cst_16 : f32 to vector<16x256xf32>
      %20 = arith.mulf %16, %19 : vector<16x256xf32>
      %21 = math.erf %20 : vector<16x256xf32>
      %cst_17 = arith.constant 1.000000e+00 : f32
      %22 = vector.broadcast %cst_17 : f32 to vector<16x256xf32>
      %23 = arith.addf %22, %21 : vector<16x256xf32>
      %24 = arith.mulf %18, %23 : vector<16x256xf32>
      %cst_18 = arith.constant dense<0.000000e+00> : vector<16xf32>
      %25 = vector.multi_reduction <add>, %24, %cst_18 [1] : vector<16x256xf32> to vector<16xf32>
      %26 = vector.shape_cast %25 : vector<16xf32> to vector<16x1xf32>
      %cst_19 = arith.constant 2.560000e+02 : f32
      %27 = vector.broadcast %cst_19 : f32 to vector<16x1xf32>
      %28 = arith.divf %26, %27 : vector<16x1xf32>
      %29 = arith.mulf %24, %24 : vector<16x256xf32>
      %cst_20 = arith.constant dense<0.000000e+00> : vector<16xf32>
      %30 = vector.multi_reduction <add>, %29, %cst_20 [1] : vector<16x256xf32> to vector<16xf32>
      %31 = vector.shape_cast %30 : vector<16xf32> to vector<16x1xf32>
      %cst_21 = arith.constant 2.560000e+02 : f32
      %32 = vector.broadcast %cst_21 : f32 to vector<16x1xf32>
      %33 = arith.divf %31, %32 : vector<16x1xf32>
      %34 = arith.mulf %28, %28 : vector<16x1xf32>
      %35 = arith.subf %33, %34 : vector<16x1xf32>
      %cst_22 = arith.constant 0.000000e+00 : f32
      %36 = vector.broadcast %cst_22 : f32 to vector<16x1xf32>
      %37 = arith.maximumf %35, %36 : vector<16x1xf32>
      %38 = vector.broadcast %28 : vector<16x1xf32> to vector<16x256xf32>
      %39 = arith.subf %24, %38 : vector<16x256xf32>
      %cst_23 = arith.constant 9.99999996E-13 : f32
      %40 = vector.broadcast %cst_23 : f32 to vector<16x1xf32>
      %41 = arith.addf %37, %40 : vector<16x1xf32>
      %42 = math.rsqrt %41 : vector<16x1xf32>
      %43 = vector.broadcast %42 : vector<16x1xf32> to vector<16x256xf32>
      %44 = arith.mulf %39, %43 : vector<16x256xf32>
      %c1 = arith.constant 1 : index
      %c0_24 = arith.constant 0 : index
      %45 = vector.load %arg4[%c1, %c0_24] : memref<3x256xf32, #tpu.memory_space<vmem>>, vector<1x256xf32>
      %46 = vector.broadcast %45 : vector<1x256xf32> to vector<16x256xf32>
      %47 = arith.mulf %44, %46 : vector<16x256xf32>
      %c2 = arith.constant 2 : index
      %c0_25 = arith.constant 0 : index
      %48 = vector.load %arg4[%c2, %c0_25] : memref<3x256xf32, #tpu.memory_space<vmem>>, vector<1x256xf32>
      %49 = vector.broadcast %48 : vector<1x256xf32> to vector<16x256xf32>
      %50 = arith.addf %47, %49 : vector<16x256xf32>
      %51 = arith.truncf %50 : vector<16x256xf32> to vector<16x256xbf16>
      %c0_26 = arith.constant 0 : index
      %c0_27 = arith.constant 0 : index
      %52 = vector.load %arg8[%c0_26, %c0_27] : memref<16x256xbf16, #tpu.memory_space<vmem>>, vector<16x256xbf16>
      tpu.vector_store %arg8[%c0_26, %c0_27], %51 {strides = array<i32>} : memref<16x256xbf16, #tpu.memory_space<vmem>>, vector<16x256xbf16>,
    } else {
    }
    %c0 = arith.constant 0 : index
    %c0_1 = arith.constant 0 : index
    %3 = vector.load %arg8[%c0, %c0_1] : memref<16x256xbf16, #tpu.memory_space<vmem>>, vector<16x256xbf16>
    %c0_2 = arith.constant 0 : index
    %c0_3 = arith.constant 0 : index
    %4 = vector.load %arg5[%c0_2, %c0_3] : memref<256x128xbf16, #tpu.memory_space<vmem>>, vector<256x128xbf16>
    %cst = arith.constant dense<0.000000e+00> : vector<16x128xf32>
    %5 = tpu.matmul %3, %4, %cst {dimension_numbers = #tpu.dot_dimension_numbers<[1], [0], [0], [1], [0, 0, 1, 1], [], []>} : vector<16x256xbf16>, vector<256x128xbf16>, vector<16x128xf32> -> vector<16x128xf32>
    %c0_4 = arith.constant 0 : index
    %c0_5 = arith.constant 0 : index
    %6 = vector.load %arg6[%c0_4, %c0_5] : memref<1x128xf32, #tpu.memory_space<vmem>>, vector<1x128xf32>
    %7 = vector.broadcast %6 : vector<1x128xf32> to vector<16x128xf32>
    %8 = arith.addf %5, %7 : vector<16x128xf32>
    %c0_6 = arith.constant 0 : index
    %c0_7 = arith.constant 0 : index
    %9 = vector.load %arg7[%c0_6, %c0_7] : memref<16x128xf32, #tpu.memory_space<vmem>>, vector<16x128xf32>
    tpu.vector_store %arg7[%c0_6, %c0_7], %8 {strides = array<i32>} : memref<16x128xf32, #tpu.memory_space<vmem>>, vector<16x128xf32>,
    return
  }
  func.func @transform_0(%arg0: i32, %arg1: i32) -> (i32, i32) {
    %c0_i32 = arith.constant 0 : i32
    %c0_i32_0 = arith.constant 0 : i32
    return %arg0, %c0_i32 : i32, i32
  }
  func.func @transform_1(%arg0: i32, %arg1: i32) -> (i32, i32) {
    %c0_i32 = arith.constant 0 : i32
    %c0_i32_0 = arith.constant 0 : i32
    %c0_i32_1 = arith.constant 0 : i32
    return %c0_i32, %c0_i32_0 : i32, i32
  }
  func.func @transform_2(%arg0: i32, %arg1: i32) -> (i32, i32) {
    %c0_i32 = arith.constant 0 : i32
    %c0_i32_0 = arith.constant 0 : i32
    %c0_i32_1 = arith.constant 0 : i32
    return %c0_i32, %c0_i32_0 : i32, i32
  }
  func.func @transform_3(%arg0: i32, %arg1: i32) -> (i32, i32) {
    %c0_i32 = arith.constant 0 : i32
    %c0_i32_0 = arith.constant 0 : i32
    return %c0_i32, %arg1 : i32, i32
  }
  func.func @transform_4(%arg0: i32, %arg1: i32) -> (i32, i32) {
    %c0_i32 = arith.constant 0 : i32
    %c0_i32_0 = arith.constant 0 : i32
    return %c0_i32, %arg1 : i32, i32
  }
  func.func @transform_5(%arg0: i32, %arg1: i32) -> (i32, i32) {
    %c0_i32 = arith.constant 0 : i32
    return %arg0, %arg1 : i32, i32
  }
}

</mosaic_0001>

<bundles_post_ra>
// kernel: bert_visual_answer_head.1
= control target key start
LH: loop header
LB: loop body
LE: loop exit
PB: predicated region body
PF: predicated region fallthrough
CT: control target
= control target key end

     0   :  { %10 = vsyncpa [#allocation4], 0  ;;  %s877_s0 = inlined_call_operand.hbm [shape: f32[16,128], index: 0, kind: input, shape index: {}]   ;;  %s878_s1 = inlined_call_operand.hbm [shape: bf16[128,256], index: 1, kind: input, shape index: {}]   ;;  %s879_s2 = inlined_call_operand.vmem [shape: f32[3,256], index: 2, kind: input, shape index: {}]   ;;  %s880_s3 = inlined_call_operand.hbm [shape: bf16[256,128], index: 3, kind: input, shape index: {}]   ;;  %s881_s4 = inlined_call_operand.vmem [shape: f32[1,128], index: 4, kind: input, shape index: {}]   ;;  %s882_s5 = inlined_call_operand.hbm [shape: f32[16,128], index: 5, kind: output, shape index: {}]  }
   0x1   :  { %11 = vsyncpa [#allocation7], 0 }
   0x2   :  { %12 = vsyncpa [#allocation5], 0  ;;  %s728_s18 = smov [#allocation6]   ;;  %s729_s20 = smov [#allocation3]  }
   0x3   :  { %s30_s19 = sshll.u32 %s728_s18, 4  ;;  %s18_s21 = sshll.u32 %s729_s20, 4  ;;  %s31_s19 = int_to_ptr.vmem [resolvable:$true] %s30_s19  ;;  %s767_s21 = int_to_ptr.vmem [resolvable:$true] %s18_s21 }
   0x4   :  { %s634_s24 = scalar_lea.hbm %s878_s1, 2048 }
   0x5   :  { %p635_p0 = scmp.ne.s32.totalorder %s878_s1, %s634_s24  ;;  %p638_p1 = scmp.lt.u32.totalorder %s634_s24, %s878_s1 }
   0x7   :  { %p640_p2 = pnand %p638_p1, %p635_p0 }
   0x9   :  { %643 = shalt.err (!%p640_p2)
}
   0xa   :  { %s644_s29 = scalar_lea.vmem %s31_s19, 2048  ;;  %p649_p4 = scmp.lt.s32.totalorder %s31_s19, %s31_s19 }
   0xb   :  { %p645_p3 = scmp.ne.s32.totalorder %s31_s19, %s644_s29  ;;  %p650_p5 = scmp.lt.s32.totalorder %s644_s29, %s644_s29 }
   0xd   :  { %p651_p6 = por %p650_p5, %p649_p4 }
   0xf   :  { %p652_p7 = pnand %p651_p6, %p645_p3 }
  0x11   :  { %655 = shalt.err (!%p652_p7)
}
  0x12   :  { %s730_s30 = smov 128   ;;  %s731_s6 = smov 8  }
  0x13   :  { %36 = dma.hbm_to_vmem [thread:$0]  %s878_s1, 2048, %s31_s19, [#allocation7], %s730_s30, %s730_s30, %s731_s6  }
  0x14   :  { %s656_s11 = scalar_lea.hbm %s877_s0, 256 }
  0x15   :  { %p657_p8 = scmp.ne.s32.totalorder %s877_s0, %s656_s11  ;;  %p660_p9 = scmp.lt.u32.totalorder %s656_s11, %s877_s0 }
  0x17   :  { %p662_p10 = pnand %p660_p9, %p657_p8 }
  0x19   :  { %665 = shalt.err (!%p662_p10)
}
  0x1a   :  { %s666_s16 = scalar_lea.vmem %s767_s21, 256  ;;  %p671_p12 = scmp.lt.s32.totalorder %s767_s21, %s767_s21 }
  0x1b   :  { %p667_p11 = scmp.ne.s32.totalorder %s767_s21, %s666_s16  ;;  %p672_p13 = scmp.lt.s32.totalorder %s666_s16, %s666_s16 }
  0x1d   :  { %p673_p0 = por %p672_p13, %p671_p12 }
  0x1f   :  { %p674_p1 = pnand %p673_p0, %p667_p11 }
  0x21   :  { %677 = shalt.err (!%p674_p1)
}
  0x22   :  { %24 = dma.hbm_to_vmem [thread:$0]  %s877_s0, 256, %s767_s21, [#allocation4], %s730_s30, %s730_s30, %s731_s6  }
  0x23   :  { %s732_s18 = smov [#allocation8]   ;;  %s678_s23 = scalar_lea.hbm %s880_s3, 2048 }
  0x24   :  { %s44_s19 = sshll.u32 %s732_s18, 4  ;;  %p679_p2 = scmp.ne.s32.totalorder %s880_s3, %s678_s23  ;;  %s45_s19 = int_to_ptr.vmem [resolvable:$true] %s44_s19 }
  0x25   :  { %p682_p3 = scmp.lt.u32.totalorder %s678_s23, %s880_s3 }
  0x27   :  { %p684_p4 = pnand %p682_p3, %p679_p2 }
  0x29   :  { %687 = shalt.err (!%p684_p4)
}
  0x2a   :  { %s688_s28 = scalar_lea.vmem %s45_s19, 2048  ;;  %p693_p6 = scmp.lt.s32.totalorder %s45_s19, %s45_s19 }
  0x2b   :  { %p689_p5 = scmp.ne.s32.totalorder %s45_s19, %s688_s28  ;;  %p694_p7 = scmp.lt.s32.totalorder %s688_s28, %s688_s28 }
  0x2d   :  { %p695_p8 = por %p694_p7, %p693_p6 }
  0x2f   :  { %p696_p9 = pnand %p695_p8, %p689_p5 }
  0x31   :  { %699 = shalt.err (!%p696_p9)
}
  0x32   :  { %s733_s0 = smov 64   ;;  %s734_s21 = smov 4  }
  0x33   :  { %50 = dma.hbm_to_vmem [thread:$0]  %s880_s3, 2048, %s45_s19, [#allocation7], %s733_s0, %s733_s0, %s734_s21  }
  0x34   :  { %722 = dma.done.wait [#allocation4], 256  }
  0x35   :  { %723 = vsyncadd [#allocation4], 4294967040 }
  0x36   :  { %724 = dma.done.wait [#allocation7], 4096  }
  0x37   :  { %725 = vsyncadd [#allocation7], 4294963200  ;;  %v735_v0 = vmov 0   ;;  %v582_v1 = vld [vmem:[#allocation6 + $0x4] ss:$8 sps:$4 sm:$0xff]   ;;  %v67_v17 = vld [vmem:[#allocation3] sm:$0xff]  ;;  %v88_v20 = vlaneseq }
  0x38   :  { %210 = vmatprep.mubr.bf16.mxu0 %v735_v0  ;;  %v584_v2 = vld [vmem:[#allocation6] ss:$8 sps:$4 sm:$0xff]   ;;  %178 = vmatprep.subr.bf16.mxu0 %v582_v1  ;;  %v585_v3 = vld [vmem:[#allocation6 + $0x14] ss:$8 sps:$4 sm:$0xff]   ;;  %v587_v4 = vld [vmem:[#allocation6 + $0x10] ss:$8 sps:$4 sm:$0xff]  }
  0x39   :  { %179 = vmatpush1.bf16.msra.mxu0 %v584_v2  ;;  %v588_v5 = vld [vmem:[#allocation6 + $0x24] ss:$8 sps:$4 sm:$0xff]   ;;  %v590_v6 = vld [vmem:[#allocation6 + $0x20] ss:$8 sps:$4 sm:$0xff]   ;;  %v591_v7 = vld [vmem:[#allocation6 + $0x34] ss:$8 sps:$4 sm:$0xff]  }
  0x3a   :  { %180 = vmatprep.subr.bf16.mxu0 %v585_v3  ;;  %v593_v8 = vld [vmem:[#allocation6 + $0x30] ss:$8 sps:$4 sm:$0xff]   ;;  %v594_v9 = vld [vmem:[#allocation6 + $0x44] ss:$8 sps:$4 sm:$0xff]   ;;  %v596_v10 = vld [vmem:[#allocation6 + $0x40] ss:$8 sps:$4 sm:$0xff]  }
  0x3b   :  { %v597_v11 = vld [vmem:[#allocation6 + $0x54] ss:$8 sps:$4 sm:$0xff]   ;;  %v599_v12 = vld [vmem:[#allocation6 + $0x50] ss:$8 sps:$4 sm:$0xff]   ;;  %v600_v13 = vld [vmem:[#allocation6 + $0x64] ss:$8 sps:$4 sm:$0xff]  }
  0x3c   :  { %v602_v14 = vld [vmem:[#allocation6 + $0x60] ss:$8 sps:$4 sm:$0xff]   ;;  %v603_v15 = vld [vmem:[#allocation6 + $0x74] ss:$8 sps:$4 sm:$0xff]   ;;  %v605_v16 = vld [vmem:[#allocation6 + $0x70] ss:$8 sps:$4 sm:$0xff]  }
  0x3d   :  { %181 = vmatpush1.bf16.msra.mxu0 %v587_v4  ;;  %v68_v18 = vld [vmem:[#allocation3 + $0x8] sm:$0xff]  ;;  %v89_v21 = vshrl.u32 %v88_v20, 7  ;;  %v86_v23 = vld [vmem:[%s879_s2] ss:$4 sm:$0x3]  ;;  %v606_v63 = vld [vmem:[#allocation8 + $0x40] sm:$0xff]  }
  0x3e   :  { %182 = vmatprep.subr.bf16.mxu0 %v588_v5  ;;  %v69_v19 = vpack.c.bf16 %v68_v18, %v67_v17  ;;  %v607_v0 = vld [vmem:[#allocation8] sm:$0xff]   ;;  %551 = vmatprep.subr.bf16.mxu1 %v606_v63  ;;  %v608_v1 = vld [vmem:[#allocation8 + $0x48] sm:$0xff]   ;;  %v610_v3 = vld [vmem:[#allocation8 + $0x50] sm:$0xff]   ;;  %s736_s14 = smov [#allocation9]  }
  0x3f   :  { %v816_v22 = vsub.s32 0, %v89_v21  ;;  %v821_v24 = vsub.s32 1, %v89_v21  ;;  %552 = vmatpush3.bf16.msra.mxu1 %v607_v0  ;;  %v609_v2 = vld [vmem:[#allocation8 + $0x8] sm:$0xff]   ;;  %v611_v4 = vld [vmem:[#allocation8 + $0x10] sm:$0xff]   ;;  %v612_v5 = vld [vmem:[#allocation8 + $0x58] sm:$0xff]   ;;  %s503_s15 = sshll.u32 %s736_s14, 4  ;;  %s504_s15 = int_to_ptr.vmem [resolvable:$true] %s503_s15 }
  0x40   :  { %553 = vmatprep.subr.bf16.mxu1 %v608_v1  ;;  %s700_s16 = scalar_lea.vmem %s504_s15, 256  ;;  %p705_p11 = scmp.lt.s32.totalorder %s504_s15, %s504_s15 }
  0x41   :  { %183 = vmatpush1.bf16.msra.mxu0 %v590_v6  ;;  %v91_v25 = vrot.slane %v86_v23, %v816_v22  ;;  %v95_v26 = vrot.slane %v86_v23, %v821_v24  ;;  %v613_v6 = vld [vmem:[#allocation8 + $0x18] sm:$0xff]   ;;  %p701_p10 = scmp.ne.s32.totalorder %s504_s15, %s700_s16  ;;  %p706_p12 = scmp.lt.s32.totalorder %s700_s16, %s700_s16 }
  0x42   :  { %184 = vmatprep.subr.bf16.mxu0 %v591_v7  ;;  %v614_v7 = vld [vmem:[#allocation8 + $0x60] sm:$0xff]  }
  0x43   :  { %554 = vmatpush3.bf16.msra.mxu1 %v609_v2  ;;  %p707_p13 = por %p706_p12, %p705_p11 }
  0x44   :  { %555 = vmatprep.subr.bf16.mxu1 %v610_v3 }
  0x45   :  { %185 = vmatpush1.bf16.msra.mxu0 %v593_v8  ;;  %v615_v8 = vld [vmem:[#allocation8 + $0x20] sm:$0xff]   ;;  %p708_p0 = pnand %p707_p13, %p701_p10 }
  0x46   :  { %186 = vmatprep.subr.bf16.mxu0 %v594_v9  ;;  %v616_v9 = vld [vmem:[#allocation8 + $0x68] sm:$0xff]  }
  0x47   :  { %556 = vmatpush3.bf16.msra.mxu1 %v611_v4 }
  0x48   :  { %557 = vmatprep.subr.bf16.mxu1 %v612_v5 }
  0x49   :  { %187 = vmatpush1.bf16.msra.mxu0 %v596_v10  ;;  %v617_v10 = vld [vmem:[#allocation8 + $0x28] sm:$0xff]  }
  0x4a   :  { %188 = vmatprep.subr.bf16.mxu0 %v597_v11  ;;  %v618_v11 = vld [vmem:[#allocation8 + $0x70] sm:$0xff]  }
  0x4b   :  { %558 = vmatpush3.bf16.msra.mxu1 %v613_v6 }
  0x4c   :  { %559 = vmatprep.subr.bf16.mxu1 %v614_v7 }
  0x4d   :  { %189 = vmatpush1.bf16.msra.mxu0 %v599_v12  ;;  %v619_v12 = vld [vmem:[#allocation8 + $0x30] sm:$0xff]  }
  0x4e   :  { %190 = vmatprep.subr.bf16.mxu0 %v600_v13  ;;  %v620_v13 = vld [vmem:[#allocation8 + $0x78] sm:$0xff]  }
  0x4f   :  { %560 = vmatpush3.bf16.msra.mxu1 %v615_v8 }
  0x50   :  { %561 = vmatprep.subr.bf16.mxu1 %v616_v9 }
  0x51   :  { %191 = vmatpush1.bf16.msra.mxu0 %v602_v14  ;;  %v621_v14 = vld [vmem:[#allocation8 + $0x38] sm:$0xff]  }
  0x52   :  { %192 = vmatprep.subr.bf16.mxu0 %v603_v15 }
  0x53   :  { %562 = vmatpush3.bf16.msra.mxu1 %v617_v10 }
  0x54   :  { %563 = vmatprep.subr.bf16.mxu1 %v618_v11 }
  0x55   :  { %193 = vmatpush1.bf16.msra.mxu0 %v605_v16 }
  0x57   :  { %564 = vmatpush3.bf16.msra.mxu1 %v619_v12 }
  0x58   :  { %211 = vmatmul.mubr.bf16.vlgmr.msra.gmra.mrb[0].mxu0 %v69_v19  ;;  %565 = vmatprep.subr.bf16.mxu1 %v620_v13 }
  0x5b   :  { %566 = vmatpush3.bf16.msra.mxu1 %v621_v14 }
 0x12b   :  { %v212_v27 = vpop.f32.mrb[0].mxu0 }
 0x12c   :  { %v213_v28 = vadd.f32 %v212_v27, %v91_v25  ;;  %v214_v29 = vpop.f32.mrb[1].mxu0 }
 0x12d   :  { %v215_v30 = vadd.f32 %v214_v29, %v95_v26  ;;  %v216_v31 = vpop.f32.mrb[2].mxu0 }
 0x12e   :  { %v225_v32 = vmul.f32 0.70710677, %v213_v28  ;;  %v217_v33 = vadd.f32 %v216_v31, %v91_v25  ;;  %v218_v34 = vpop.f32.mrb[3].mxu0  ;;  %v221_v41 = vmul.f32 0.5, %v213_v28 }
 0x12f   :  { %v226_v35 = vmul.f32 0.70710677, %v215_v30  ;;  %v219_v36 = vadd.f32 %v218_v34, %v95_v26  ;;  %v222_v44 = vmul.f32 0.5, %v215_v30 }
 0x130   :  { %622 = verf.f32 %v225_v32  ;;  %v227_v37 = vmul.f32 0.70710677, %v217_v33  ;;  %v223_v47 = vmul.f32 0.5, %v217_v33  ;;  %v532_v33 = vld [vmem:[%s879_s2 + $0x1] ss:$4 sm:$0x3] }
 0x131   :  { %624 = verf.f32 %v226_v35  ;;  %v228_v38 = vmul.f32 0.70710677, %v219_v36  ;;  %v224_v50 = vmul.f32 0.5, %v219_v36 }
 0x132   :  { %626 = verf.f32 %v227_v37 }
 0x133   :  { %628 = verf.f32 %v228_v38  ;;  %v286_v38 = vrot.slane %v532_v33, %v816_v22 }
 0x13a   :  { %v623_v39 = vpop.eup %622 }
 0x13b   :  { %v625_v40 = vpop.eup %624  ;;  %v233_v42 = vadd.f32 1.0, %v623_v39  ;;  %v290_v39 = vrot.slane %v532_v33, %v821_v24 }
 0x13c   :  { %v627_v43 = vpop.eup %626  ;;  %v234_v45 = vadd.f32 1.0, %v625_v40  ;;  %v533_v40 = vld [vmem:[%s879_s2 + $0x2] ss:$4 sm:$0x3] }
 0x13d   :  { %v629_v46 = vpop.eup %628  ;;  %v235_v48 = vadd.f32 1.0, %v627_v43  ;;  %v825_v49 = vmul.f32 %v233_v42, %v221_v41 }
 0x13e   :  { %v236_v51 = vadd.f32 1.0, %v629_v46  ;;  %v827_v52 = vmul.f32 %v234_v45, %v222_v44  ;;  %v303_v45 = vrot.slane %v533_v40, %v816_v22  ;;  %v307_v46 = vrot.slane %v533_v40, %v821_v24  ;;  %v534_v22 = vld [vmem:[%s881_s4] ss:$0 sm:$0xff] }
 0x13f   :  { %v829_v53 = vmul.f32 %v235_v48, %v223_v47  ;;  %v250_v54 = vmul.f32 %v825_v49, %v825_v49 }
 0x140   :  { %v833_v55 = vmul.f32 %v236_v51, %v224_v50  ;;  %v241_v56 = vadd.f32 %v827_v52, %v825_v49  ;;  %v251_v57 = vmul.f32 %v827_v52, %v827_v52 }
 0x141   :  { %v252_v59 = vmul.f32 %v829_v53, %v829_v53 }
 0x142   :  { %242 = vadd.xlane.f32.xlu0 %v241_v56  ;;  %v254_v58 = vadd.f32 %v251_v57, %v250_v54  ;;  %v253_v60 = vmul.f32 %v833_v55, %v833_v55  ;;  %v244_v61 = vadd.f32 %v833_v55, %v829_v53 }
 0x144   :  { %255 = vadd.xlane.f32.xlu1 %v254_v58  ;;  %v257_v62 = vadd.f32 %v253_v60, %v252_v59 }
 0x146   :  { %245 = vadd.xlane.f32.xlu0 %v244_v61 }
 0x148   :  { %258 = vadd.xlane.f32.xlu1 %v257_v62 }
 0x1cf   :  { %v243_v15 = vpop.xlane.xlu0 %242 }
 0x1d0   :  { %v248_v16 = vmul.f32 0.00390625, %v243_v15 }
 0x1d1   :  { %v256_v17 = vpop.xlane.xlu1 %255 }
 0x1d2   :  { %v260_v18 = vmul.f32 0.00390625, %v256_v17  ;;  %v262_v19 = vmul.f32 %v248_v16, %v248_v16  ;;  %v268_v35 = vsub.f32 %v825_v49, %v248_v16  ;;  %v269_v36 = vsub.f32 %v827_v52, %v248_v16 }
 0x1d3   :  { %v246_v20 = vpop.xlane.xlu0 %245 }
 0x1d4   :  { %v264_v21 = vsub.f32 %v260_v18, %v262_v19  ;;  %v249_v23 = vmul.f32 0.00390625, %v246_v20 }
 0x1d5   :  { %v259_v25 = vpop.xlane.xlu1 %258 }
 0x1d6   :  { %v266_v26 = vmax.f32 %v264_v21, 0.0  ;;  %v261_v27 = vmul.f32 0.00390625, %v259_v25  ;;  %v263_v28 = vmul.f32 %v249_v23, %v249_v23  ;;  %v270_v42 = vsub.f32 %v829_v53, %v249_v23 }
 0x1d7   :  { %v271_v43 = vsub.f32 %v833_v55, %v249_v23 }
 0x1d8   :  { %v272_v29 = vadd.f32 1e-12, %v266_v26  ;;  %v265_v30 = vsub.f32 %v261_v27, %v263_v28 }
 0x1da   :  { %630 = vrsqrt.f32 %v272_v29  ;;  %v267_v31 = vmax.f32 %v265_v30, 0.0 }
 0x1dc   :  { %v273_v32 = vadd.f32 1e-12, %v267_v31 }
 0x1de   :  { %632 = vrsqrt.f32 %v273_v32 }
 0x1e4   :  { %v631_v34 = vpop.eup %630 }
 0x1e5   :  { %v277_v37 = vmul.f32 %v631_v34, %v269_v36  ;;  %v276_v41 = vmul.f32 %v631_v34, %v268_v35 }
 0x1e7   :  { %v294_v48 = vmul.f32 %v290_v39, %v277_v37  ;;  %v293_v50 = vmul.f32 %v286_v38, %v276_v41 }
 0x1e8   :  { %v633_v44 = vpop.eup %632 }
 0x1e9   :  { %v279_v47 = vmul.f32 %v633_v44, %v271_v43  ;;  %v278_v49 = vmul.f32 %v633_v44, %v270_v42  ;;  %v311_v54 = vadd.f32 %v307_v46, %v294_v48  ;;  %v310_v57 = vadd.f32 %v303_v45, %v293_v50 }
 0x1eb   :  { %v296_v51 = vmul.f32 %v290_v39, %v279_v47  ;;  %v295_v52 = vmul.f32 %v286_v38, %v278_v49 }
 0x1ed   :  { %v313_v56 = vadd.f32 %v307_v46, %v296_v51  ;;  %v312_v58 = vadd.f32 %v303_v45, %v295_v52 }
 0x1ef   :  { %v315_v59 = vpack.c.bf16 %v313_v56, %v311_v54  ;;  %v314_v60 = vpack.c.bf16 %v312_v58, %v310_v57 }
 0x1f1   :  { %487 = vmatprep.mubr.bf16.mxu1 %v315_v59 }
 0x1f2   :  { %488 = vmatmul.mubr.bf16.vlgmr.msra.gmra.mrb[0].mxu1 %v314_v60 }
 0x2c5   :  { %v567_v53 = vpop.f32.mrb[0].mxu1 }
 0x2c6   :  { %v568_v24 = vpop.f32.mrb[1].mxu1 }
 0x2c7   :  { %v569_v55 = vadd.f32 %v568_v24, %v567_v53  ;;  %v570_v61 = vpop.f32.mrb[2].mxu1 }
 0x2c8   :  { %v571_v62 = vpop.f32.mrb[3].mxu1 }
 0x2c9   :  { %v490_v63 = vadd.f32 %v569_v55, %v534_v22  ;;  %v572_v0 = vadd.f32 %v571_v62, %v570_v61 }
 0x2cb   :  { %496 = vst [vmem:[#allocation9] sm:$0xff] %v490_v63  ;;  %v493_v1 = vadd.f32 %v572_v0, %v534_v22 }
 0x2cd   :  { %497 = vst [vmem:[#allocation9 + $0x8] sm:$0xff] %v493_v1 }
 0x2ce   :  { %711 = shalt.err (!%p708_p0)
}
 0x2cf   :  { %s712_s17 = scalar_lea.hbm %s882_s5, 256 }
 0x2d0   :  { %p713_p1 = scmp.ne.s32.totalorder %s882_s5, %s712_s17  ;;  %p716_p2 = scmp.lt.u32.totalorder %s712_s17, %s882_s5 }
 0x2d2   :  { %p718_p3 = pnand %p716_p2, %p713_p1 }
 0x2d4   :  { %721 = shalt.err (!%p718_p3)
}
 0x2d5   :  { %509 = dma.vmem_to_hbm [thread:$0]  %s504_s15, 256, %s882_s5, [#allocation5], %s730_s30, %s730_s30, %s731_s6  }
 0x2d6   :  { %726 = dma.done.wait [#allocation5], 256  }
 0x2d7   :  { %727 = vsyncadd [#allocation5], 4294967040 }
 0x2d8   :  { %513 = vsyncpa [#allocation4], 1 }
 0x2d9   :  { %514 = vsyncpa [#allocation7], 1 }
 0x2da   :  { %515 = vsyncpa [#allocation5], 1 }

// kernel: bert_visual_answer_head.1
= control target key start
LH: loop header
LB: loop body
LE: loop exit
PB: predicated region body
PF: predicated region fallthrough
CT: control target
= control target key end

     0   :  { %10 = vsyncpa [#allocation4], 0  ;;  %s877_s0 = inlined_call_operand.hbm [shape: f32[16,128], index: 0, kind: input, shape index: {}]   ;;  %s878_s1 = inlined_call_operand.hbm [shape: bf16[128,256], index: 1, kind: input, shape index: {}]   ;;  %s879_s2 = inlined_call_operand.vmem [shape: f32[3,256], index: 2, kind: input, shape index: {}]   ;;  %s880_s3 = inlined_call_operand.hbm [shape: bf16[256,128], index: 3, kind: input, shape index: {}]   ;;  %s881_s4 = inlined_call_operand.vmem [shape: f32[1,128], index: 4, kind: input, shape index: {}]   ;;  %s882_s5 = inlined_call_operand.hbm [shape: f32[16,128], index: 5, kind: output, shape index: {}]  }
   0x1   :  { %11 = vsyncpa [#allocation7], 0 }
   0x2   :  { %12 = vsyncpa [#allocation5], 0  ;;  %s728_s18 = smov [#allocation6]   ;;  %s729_s20 = smov [#allocation3]  }
   0x3   :  { %s30_s19 = sshll.u32 %s728_s18, 4  ;;  %s18_s21 = sshll.u32 %s729_s20, 4  ;;  %s31_s19 = int_to_ptr.vmem [resolvable:$true] %s30_s19  ;;  %s767_s21 = int_to_ptr.vmem [resolvable:$true] %s18_s21 }
   0x4   :  { %s634_s24 = scalar_lea.hbm %s878_s1, 2048 }
   0x5   :  { %p635_p0 = scmp.ne.s32.totalorder %s878_s1, %s634_s24  ;;  %p638_p1 = scmp.lt.u32.totalorder %s634_s24, %s878_s1 }
   0x7   :  { %p640_p2 = pnand %p638_p1, %p635_p0 }
   0x9   :  { %643 = shalt.err (!%p640_p2)
}
   0xa   :  { %s644_s29 = scalar_lea.vmem %s31_s19, 2048  ;;  %p649_p4 = scmp.lt.s32.totalorder %s31_s19, %s31_s19 }
   0xb   :  { %p645_p3 = scmp.ne.s32.totalorder %s31_s19, %s644_s29  ;;  %p650_p5 = scmp.lt.s32.totalorder %s644_s29, %s644_s29 }
   0xd   :  { %p651_p6 = por %p650_p5, %p649_p4 }
   0xf   :  { %p652_p7 = pnand %p651_p6, %p645_p3 }
  0x11   :  { %655 = shalt.err (!%p652_p7)
}
  0x12   :  { %s730_s30 = smov 128   ;;  %s731_s6 = smov 8  }
  0x13   :  { %36 = dma.hbm_to_vmem [thread:$0]  %s878_s1, 2048, %s31_s19, [#allocation7], %s730_s30, %s730_s30, %s731_s6  }
  0x14   :  { %s656_s11 = scalar_lea.hbm %s877_s0, 256 }
  0x15   :  { %p657_p8 = scmp.ne.s32.totalorder %s877_s0, %s656_s11  ;;  %p660_p9 = scmp.lt.u32.totalorder %s656_s11, %s877_s0 }
  0x17   :  { %p662_p10 = pnand %p660_p9, %p657_p8 }
  0x19   :  { %665 = shalt.err (!%p662_p10)
}
  0x1a   :  { %s666_s16 = scalar_lea.vmem %s767_s21, 256  ;;  %p671_p12 = scmp.lt.s32.totalorder %s767_s21, %s767_s21 }
  0x1b   :  { %p667_p11 = scmp.ne.s32.totalorder %s767_s21, %s666_s16  ;;  %p672_p13 = scmp.lt.s32.totalorder %s666_s16, %s666_s16 }
  0x1d   :  { %p673_p0 = por %p672_p13, %p671_p12 }
  0x1f   :  { %p674_p1 = pnand %p673_p0, %p667_p11 }
  0x21   :  { %677 = shalt.err (!%p674_p1)
}
  0x22   :  { %24 = dma.hbm_to_vmem [thread:$0]  %s877_s0, 256, %s767_s21, [#allocation4], %s730_s30, %s730_s30, %s731_s6  }
  0x23   :  { %s732_s18 = smov [#allocation8]   ;;  %s678_s23 = scalar_lea.hbm %s880_s3, 2048 }
  0x24   :  { %s44_s19 = sshll.u32 %s732_s18, 4  ;;  %p679_p2 = scmp.ne.s32.totalorder %s880_s3, %s678_s23  ;;  %s45_s19 = int_to_ptr.vmem [resolvable:$true] %s44_s19 }
  0x25   :  { %p682_p3 = scmp.lt.u32.totalorder %s678_s23, %s880_s3 }
  0x27   :  { %p684_p4 = pnand %p682_p3, %p679_p2 }
  0x29   :  { %687 = shalt.err (!%p684_p4)
}
  0x2a   :  { %s688_s28 = scalar_lea.vmem %s45_s19, 2048  ;;  %p693_p6 = scmp.lt.s32.totalorder %s45_s19, %s45_s19 }
  0x2b   :  { %p689_p5 = scmp.ne.s32.totalorder %s45_s19, %s688_s28  ;;  %p694_p7 = scmp.lt.s32.totalorder %s688_s28, %s688_s28 }
  0x2d   :  { %p695_p8 = por %p694_p7, %p693_p6 }
  0x2f   :  { %p696_p9 = pnand %p695_p8, %p689_p5 }
  0x31   :  { %699 = shalt.err (!%p696_p9)
}
  0x32   :  { %s733_s0 = smov 64   ;;  %s734_s21 = smov 4  }
  0x33   :  { %50 = dma.hbm_to_vmem [thread:$0]  %s880_s3, 2048, %s45_s19, [#allocation7], %s733_s0, %s733_s0, %s734_s21  }
  0x34   :  { %722 = dma.done.wait [#allocation4], 256  }
  0x35   :  { %723 = vsyncadd [#allocation4], 4294967040 }
  0x36   :  { %724 = dma.done.wait [#allocation7], 4096  }
  0x37   :  { %725 = vsyncadd [#allocation7], 4294963200  ;;  %v735_v0 = vmov 0   ;;  %v582_v1 = vld [vmem:[#allocation6 + $0x4] ss:$8 sps:$4 sm:$0xff]   ;;  %v67_v17 = vld [vmem:[#allocation3] sm:$0xff]  ;;  %v88_v20 = vlaneseq }
  0x38   :  { %210 = vmatprep.mubr.bf16.mxu0 %v735_v0  ;;  %v584_v2 = vld [vmem:[#allocation6] ss:$8 sps:$4 sm:$0xff]   ;;  %178 = vmatprep.subr.bf16.mxu0 %v582_v1  ;;  %v585_v3 = vld [vmem:[#allocation6 + $0x14] ss:$8 sps:$4 sm:$0xff]   ;;  %v587_v4 = vld [vmem:[#allocation6 + $0x10] ss:$8 sps:$4 sm:$0xff]  }
  0x39   :  { %179 = vmatpush1.bf16.msra.mxu0 %v584_v2  ;;  %v588_v5 = vld [vmem:[#allocation6 + $0x24] ss:$8 sps:$4 sm:$0xff]   ;;  %v590_v6 = vld [vmem:[#allocation6 + $0x20] ss:$8 sps:$4 sm:$0xff]   ;;  %v591_v7 = vld [vmem:[#allocation6 + $0x34] ss:$8 sps:$4 sm:$0xff]  }
  0x3a   :  { %180 = vmatprep.subr.bf16.mxu0 %v585_v3  ;;  %v593_v8 = vld [vmem:[#allocation6 + $0x30] ss:$8 sps:$4 sm:$0xff]   ;;  %v594_v9 = vld [vmem:[#allocation6 + $0x44] ss:$8 sps:$4 sm:$0xff]   ;;  %v596_v10 = vld [vmem:[#allocation6 + $0x40] ss:$8 sps:$4 sm:$0xff]  }
  0x3b   :  { %v597_v11 = vld [vmem:[#allocation6 + $0x54] ss:$8 sps:$4 sm:$0xff]   ;;  %v599_v12 = vld [vmem:[#allocation6 + $0x50] ss:$8 sps:$4 sm:$0xff]   ;;  %v600_v13 = vld [vmem:[#allocation6 + $0x64] ss:$8 sps:$4 sm:$0xff]  }
  0x3c   :  { %v602_v14 = vld [vmem:[#allocation6 + $0x60] ss:$8 sps:$4 sm:$0xff]   ;;  %v603_v15 = vld [vmem:[#allocation6 + $0x74] ss:$8 sps:$4 sm:$0xff]   ;;  %v605_v16 = vld [vmem:[#allocation6 + $0x70] ss:$8 sps:$4 sm:$0xff]  }
  0x3d   :  { %181 = vmatpush1.bf16.msra.mxu0 %v587_v4  ;;  %v68_v18 = vld [vmem:[#allocation3 + $0x8] sm:$0xff]  ;;  %v89_v21 = vshrl.u32 %v88_v20, 7  ;;  %v86_v23 = vld [vmem:[%s879_s2] ss:$4 sm:$0x3]  ;;  %v606_v63 = vld [vmem:[#allocation8 + $0x40] sm:$0xff]  }
  0x3e   :  { %182 = vmatprep.subr.bf16.mxu0 %v588_v5  ;;  %v69_v19 = vpack.c.bf16 %v68_v18, %v67_v17  ;;  %v607_v0 = vld [vmem:[#allocation8] sm:$0xff]   ;;  %551 = vmatprep.subr.bf16.mxu1 %v606_v63  ;;  %v608_v1 = vld [vmem:[#allocation8 + $0x48] sm:$0xff]   ;;  %v610_v3 = vld [vmem:[#allocation8 + $0x50] sm:$0xff]   ;;  %s736_s14 = smov [#allocation9]  }
  0x3f   :  { %v816_v22 = vsub.s32 0, %v89_v21  ;;  %v821_v24 = vsub.s32 1, %v89_v21  ;;  %552 = vmatpush3.bf16.msra.mxu1 %v607_v0  ;;  %v609_v2 = vld [vmem:[#allocation8 + $0x8] sm:$0xff]   ;;  %v611_v4 = vld [vmem:[#allocation8 + $0x10] sm:$0xff]   ;;  %v612_v5 = vld [vmem:[#allocation8 + $0x58] sm:$0xff]   ;;  %s503_s15 = sshll.u32 %s736_s14, 4  ;;  %s504_s15 = int_to_ptr.vmem [resolvable:$true] %s503_s15 }
  0x40   :  { %553 = vmatprep.subr.bf16.mxu1 %v608_v1  ;;  %s700_s16 = scalar_lea.vmem %s504_s15, 256  ;;  %p705_p11 = scmp.lt.s32.totalorder %s504_s15, %s504_s15 }
  0x41   :  { %183 = vmatpush1.bf16.msra.mxu0 %v590_v6  ;;  %v91_v25 = vrot.slane %v86_v23, %v816_v22  ;;  %v95_v26 = vrot.slane %v86_v23, %v821_v24  ;;  %v613_v6 = vld [vmem:[#allocation8 + $0x18] sm:$0xff]   ;;  %p701_p10 = scmp.ne.s32.totalorder %s504_s15, %s700_s16  ;;  %p706_p12 = scmp.lt.s32.totalorder %s700_s16, %s700_s16 }
  0x42   :  { %184 = vmatprep.subr.bf16.mxu0 %v591_v7  ;;  %v614_v7 = vld [vmem:[#allocation8 + $0x60] sm:$0xff]  }
  0x43   :  { %554 = vmatpush3.bf16.msra.mxu1 %v609_v2  ;;  %p707_p13 = por %p706_p12, %p705_p11 }
  0x44   :  { %555 = vmatprep.subr.bf16.mxu1 %v610_v3 }
  0x45   :  { %185 = vmatpush1.bf16.msra.mxu0 %v593_v8  ;;  %v615_v8 = vld [vmem:[#allocation8 + $0x20] sm:$0xff]   ;;  %p708_p0 = pnand %p707_p13, %p701_p10 }
  0x46   :  { %186 = vmatprep.subr.bf16.mxu0 %v594_v9  ;;  %v616_v9 = vld [vmem:[#allocation8 + $0x68] sm:$0xff]  }
  0x47   :  { %556 = vmatpush3.bf16.msra.mxu1 %v611_v4 }
  0x48   :  { %557 = vmatprep.subr.bf16.mxu1 %v612_v5 }
  0x49   :  { %187 = vmatpush1.bf16.msra.mxu0 %v596_v10  ;;  %v617_v10 = vld [vmem:[#allocation8 + $0x28] sm:$0xff]  }
  0x4a   :  { %188 = vmatprep.subr.bf16.mxu0 %v597_v11  ;;  %v618_v11 = vld [vmem:[#allocation8 + $0x70] sm:$0xff]  }
  0x4b   :  { %558 = vmatpush3.bf16.msra.mxu1 %v613_v6 }
  0x4c   :  { %559 = vmatprep.subr.bf16.mxu1 %v614_v7 }
  0x4d   :  { %189 = vmatpush1.bf16.msra.mxu0 %v599_v12  ;;  %v619_v12 = vld [vmem:[#allocation8 + $0x30] sm:$0xff]  }
  0x4e   :  { %190 = vmatprep.subr.bf16.mxu0 %v600_v13  ;;  %v620_v13 = vld [vmem:[#allocation8 + $0x78] sm:$0xff]  }
  0x4f   :  { %560 = vmatpush3.bf16.msra.mxu1 %v615_v8 }
  0x50   :  { %561 = vmatprep.subr.bf16.mxu1 %v616_v9 }
  0x51   :  { %191 = vmatpush1.bf16.msra.mxu0 %v602_v14  ;;  %v621_v14 = vld [vmem:[#allocation8 + $0x38] sm:$0xff]  }
  0x52   :  { %192 = vmatprep.subr.bf16.mxu0 %v603_v15 }
  0x53   :  { %562 = vmatpush3.bf16.msra.mxu1 %v617_v10 }
  0x54   :  { %563 = vmatprep.subr.bf16.mxu1 %v618_v11 }
  0x55   :  { %193 = vmatpush1.bf16.msra.mxu0 %v605_v16 }
  0x57   :  { %564 = vmatpush3.bf16.msra.mxu1 %v619_v12 }
  0x58   :  { %211 = vmatmul.mubr.bf16.vlgmr.msra.gmra.mrb[0].mxu0 %v69_v19  ;;  %565 = vmatprep.subr.bf16.mxu1 %v620_v13 }
  0x5b   :  { %566 = vmatpush3.bf16.msra.mxu1 %v621_v14 }
 0x12b   :  { %v212_v27 = vpop.f32.mrb[0].mxu0 }
 0x12c   :  { %v213_v28 = vadd.f32 %v212_v27, %v91_v25  ;;  %v214_v29 = vpop.f32.mrb[1].mxu0 }
 0x12d   :  { %v215_v30 = vadd.f32 %v214_v29, %v95_v26  ;;  %v216_v31 = vpop.f32.mrb[2].mxu0 }
 0x12e   :  { %v225_v32 = vmul.f32 0.70710677, %v213_v28  ;;  %v217_v33 = vadd.f32 %v216_v31, %v91_v25  ;;  %v218_v34 = vpop.f32.mrb[3].mxu0  ;;  %v221_v41 = vmul.f32 0.5, %v213_v28 }
 0x12f   :  { %v226_v35 = vmul.f32 0.70710677, %v215_v30  ;;  %v219_v36 = vadd.f32 %v218_v34, %v95_v26  ;;  %v222_v44 = vmul.f32 0.5, %v215_v30 }
 0x130   :  { %622 = verf.f32 %v225_v32  ;;  %v227_v37 = vmul.f32 0.70710677, %v217_v33  ;;  %v223_v47 = vmul.f32 0.5, %v217_v33  ;;  %v532_v33 = vld [vmem:[%s879_s2 + $0x1] ss:$4 sm:$0x3] }
 0x131   :  { %624 = verf.f32 %v226_v35  ;;  %v228_v38 = vmul.f32 0.70710677, %v219_v36  ;;  %v224_v50 = vmul.f32 0.5, %v219_v36 }
 0x132   :  { %626 = verf.f32 %v227_v37 }
 0x133   :  { %628 = verf.f32 %v228_v38  ;;  %v286_v38 = vrot.slane %v532_v33, %v816_v22 }
 0x13a   :  { %v623_v39 = vpop.eup %622 }
 0x13b   :  { %v625_v40 = vpop.eup %624  ;;  %v233_v42 = vadd.f32 1.0, %v623_v39  ;;  %v290_v39 = vrot.slane %v532_v33, %v821_v24 }
 0x13c   :  { %v627_v43 = vpop.eup %626  ;;  %v234_v45 = vadd.f32 1.0, %v625_v40  ;;  %v533_v40 = vld [vmem:[%s879_s2 + $0x2] ss:$4 sm:$0x3] }
 0x13d   :  { %v629_v46 = vpop.eup %628  ;;  %v235_v48 = vadd.f32 1.0, %v627_v43  ;;  %v825_v49 = vmul.f32 %v233_v42, %v221_v41 }
 0x13e   :  { %v236_v51 = vadd.f32 1.0, %v629_v46  ;;  %v827_v52 = vmul.f32 %v234_v45, %v222_v44  ;;  %v303_v45 = vrot.slane %v533_v40, %v816_v22  ;;  %v307_v46 = vrot.slane %v533_v40, %v821_v24  ;;  %v534_v22 = vld [vmem:[%s881_s4] ss:$0 sm:$0xff] }
 0x13f   :  { %v829_v53 = vmul.f32 %v235_v48, %v223_v47  ;;  %v250_v54 = vmul.f32 %v825_v49, %v825_v49 }
 0x140   :  { %v833_v55 = vmul.f32 %v236_v51, %v224_v50  ;;  %v241_v56 = vadd.f32 %v827_v52, %v825_v49  ;;  %v251_v57 = vmul.f32 %v827_v52, %v827_v52 }
 0x141   :  { %v252_v59 = vmul.f32 %v829_v53, %v829_v53 }
 0x142   :  { %242 = vadd.xlane.f32.xlu0 %v241_v56  ;;  %v254_v58 = vadd.f32 %v251_v57, %v250_v54  ;;  %v253_v60 = vmul.f32 %v833_v55, %v833_v55  ;;  %v244_v61 = vadd.f32 %v833_v55, %v829_v53 }
 0x144   :  { %255 = vadd.xlane.f32.xlu1 %v254_v58  ;;  %v257_v62 = vadd.f32 %v253_v60, %v252_v59 }
 0x146   :  { %245 = vadd.xlane.f32.xlu0 %v244_v61 }
 0x148   :  { %258 = vadd.xlane.f32.xlu1 %v257_v62 }
 0x1cf   :  { %v243_v15 = vpop.xlane.xlu0 %242 }
 0x1d0   :  { %v248_v16 = vmul.f32 0.00390625, %v243_v15 }
 0x1d1   :  { %v256_v17 = vpop.xlane.xlu1 %255 }
 0x1d2   :  { %v260_v18 = vmul.f32 0.00390625, %v256_v17  ;;  %v262_v19 = vmul.f32 %v248_v16, %v248_v16  ;;  %v268_v35 = vsub.f32 %v825_v49, %v248_v16  ;;  %v269_v36 = vsub.f32 %v827_v52, %v248_v16 }
 0x1d3   :  { %v246_v20 = vpop.xlane.xlu0 %245 }
 0x1d4   :  { %v264_v21 = vsub.f32 %v260_v18, %v262_v19  ;;  %v249_v23 = vmul.f32 0.00390625, %v246_v20 }
 0x1d5   :  { %v259_v25 = vpop.xlane.xlu1 %258 }
 0x1d6   :  { %v266_v26 = vmax.f32 %v264_v21, 0.0  ;;  %v261_v27 = vmul.f32 0.00390625, %v259_v25  ;;  %v263_v28 = vmul.f32 %v249_v23, %v249_v23  ;;  %v270_v42 = vsub.f32 %v829_v53, %v249_v23 }
 0x1d7   :  { %v271_v43 = vsub.f32 %v833_v55, %v249_v23 }
 0x1d8   :  { %v272_v29 = vadd.f32 1e-12, %v266_v26  ;;  %v265_v30 = vsub.f32 %v261_v27, %v263_v28 }
 0x1da   :  { %630 = vrsqrt.f32 %v272_v29  ;;  %v267_v31 = vmax.f32 %v265_v30, 0.0 }
 0x1dc   :  { %v273_v32 = vadd.f32 1e-12, %v267_v31 }
 0x1de   :  { %632 = vrsqrt.f32 %v273_v32 }
 0x1e4   :  { %v631_v34 = vpop.eup %630 }
 0x1e5   :  { %v277_v37 = vmul.f32 %v631_v34, %v269_v36  ;;  %v276_v41 = vmul.f32 %v631_v34, %v268_v35 }
 0x1e7   :  { %v294_v48 = vmul.f32 %v290_v39, %v277_v37  ;;  %v293_v50 = vmul.f32 %v286_v38, %v276_v41 }
 0x1e8   :  { %v633_v44 = vpop.eup %632 }
 0x1e9   :  { %v279_v47 = vmul.f32 %v633_v44, %v271_v43  ;;  %v278_v49 = vmul.f32 %v633_v44, %v270_v42  ;;  %v311_v54 = vadd.f32 %v307_v46, %v294_v48  ;;  %v310_v57 = vadd.f32 %v303_v45, %v293_v50 }
 0x1eb   :  { %v296_v51 = vmul.f32 %v290_v39, %v279_v47  ;;  %v295_v52 = vmul.f32 %v286_v38, %v278_v49 }
 0x1ed   :  { %v313_v56 = vadd.f32 %v307_v46, %v296_v51  ;;  %v312_v58 = vadd.f32 %v303_v45, %v295_v52 }
 0x1ef   :  { %v315_v59 = vpack.c.bf16 %v313_v56, %v311_v54  ;;  %v314_v60 = vpack.c.bf16 %v312_v58, %v310_v57 }
 0x1f1   :  { %487 = vmatprep.mubr.bf16.mxu1 %v315_v59 }
 0x1f2   :  { %488 = vmatmul.mubr.bf16.vlgmr.msra.gmra.mrb[0].mxu1 %v314_v60 }
 0x2c5   :  { %v567_v53 = vpop.f32.mrb[0].mxu1 }
 0x2c6   :  { %v568_v24 = vpop.f32.mrb[1].mxu1 }
 0x2c7   :  { %v569_v55 = vadd.f32 %v568_v24, %v567_v53  ;;  %v570_v61 = vpop.f32.mrb[2].mxu1 }
 0x2c8   :  { %v571_v62 = vpop.f32.mrb[3].mxu1 }
 0x2c9   :  { %v490_v63 = vadd.f32 %v569_v55, %v534_v22  ;;  %v572_v0 = vadd.f32 %v571_v62, %v570_v61 }
 0x2cb   :  { %496 = vst [vmem:[#allocation9] sm:$0xff] %v490_v63  ;;  %v493_v1 = vadd.f32 %v572_v0, %v534_v22 }
 0x2cd   :  { %497 = vst [vmem:[#allocation9 + $0x8] sm:$0xff] %v493_v1 }
 0x2ce   :  { %711 = shalt.err (!%p708_p0)
}
 0x2cf   :  { %s712_s17 = scalar_lea.hbm %s882_s5, 256 }
 0x2d0   :  { %p713_p1 = scmp.ne.s32.totalorder %s882_s5, %s712_s17  ;;  %p716_p2 = scmp.lt.u32.totalorder %s712_s17, %s882_s5 }
 0x2d2   :  { %p718_p3 = pnand %p716_p2, %p713_p1 }
 0x2d4   :  { %721 = shalt.err (!%p718_p3)
}
 0x2d5   :  { %509 = dma.vmem_to_hbm [thread:$0]  %s504_s15, 256, %s882_s5, [#allocation5], %s730_s30, %s730_s30, %s731_s6  }
 0x2d6   :  { %726 = dma.done.wait [#allocation5], 256  }
 0x2d7   :  { %727 = vsyncadd [#allocation5], 4294967040 }
 0x2d8   :  { %513 = vsyncpa [#allocation4], 1 }
 0x2d9   :  { %514 = vsyncpa [#allocation7], 1 }
 0x2da   :  { %515 = vsyncpa [#allocation5], 1 }

</bundles_post_ra>
